<compile_context>
chip_gen: v7x
topology: tpu7x:2x2x1
jax: 0.10.0
libtpu: 0.0.40
codegen_flags: <defaults>
</compile_context>

<pallas_src>
import functools
import math

import jax
import jax.numpy as jnp
from jax.experimental import pallas as pl
from jax.experimental.pallas import tpu as pltpu

MARGIN = 50.0
EPS = 1e-6  # F.pairwise_distance default eps (added to the difference)


def _round_up(x, m):
    return ((x + m - 1) // m) * m


def _vmem_budget():
    """(bytes for double-buffered input tiles, vmem_limit_bytes), per generation."""
    vmem_cap = 64 * 1024 * 1024                      # conservative default (v7x per-TC VMEM)
    try:
        info = pltpu.get_tpu_info()
        cap = int(getattr(info, "vmem_capacity_bytes", vmem_cap))
        if cap >= 32 * 1024 * 1024:
            vmem_cap = cap
    except Exception:
        pass
    tile_budget = vmem_cap // 2          # v5e/v6e (128 MiB) -> 64 MiB, v7x (64 MiB) -> 32 MiB
    vmem_limit = (3 * vmem_cap) // 4     # 96 MiB / 48 MiB (default scoped VMEM is smaller)
    return tile_budget, vmem_limit


def _plan_tiles(b_folded, gf, itemsize):
    """Folded-batch rows per grid step + scoped-VMEM limit (bytes-based, no row cap)."""
    pack = max(8, 32 // itemsize)                    # sublane packing: f32->8, bf16->16, int8->32
    lane_gf = _round_up(gf, 128)                     # VMEM rows pad to 128 lanes
    # Per folded row, per pipeline buffer: 2 embedding tiles (native dtype,
    # lane-padded) + the label column (f32, lanes pad to 128).  On top of the
    # x2 double-buffering, reserve one f32 full-width intermediate per row
    # (the squared-diff operand consumed by the reduction / segment matmul).
    row_bytes = 2 * (2 * lane_gf * itemsize + 128 * 4) + lane_gf * 4
    tile_budget, vmem_limit = _vmem_budget()
    tb = tile_budget // row_bytes
    tb = max(pack, (tb // pack) * pack)
    tb = min(tb, _round_up(b_folded, pack))
    return tb, vmem_limit


def _contrastive_loss_kernel(*refs, margin, batch, groups, need_mask):
    if groups > 1:
        seg_ref, o1_ref, o2_ref, lbl_ref, out_ref = refs
    else:
        o1_ref, o2_ref, lbl_ref, out_ref = refs

    # Inputs arrive in their native dtype (e.g. bf16); cast on the VPU.
    o1 = o1_ref[...].astype(jnp.float32)
    o2 = o2_ref[...].astype(jnp.float32)
    lbl = lbl_ref[...]                                # (tb, groups) float32

    diff = o1 - o2 + EPS                              # eps added to the diff, like F.pairwise_distance
    sq = diff * diff                                  # (tb, groups * feat)

    if groups > 1:
        # Per-original-row squared distance via a 0/1 segment matmul on the
        # otherwise idle MXU (HIGHEST keeps ~f32 accuracy for the sums).
        d2 = jnp.dot(sq, seg_ref[...],
                     preferred_element_type=jnp.float32,
                     precision=jax.lax.Precision.HIGHEST)      # (tb, groups)
    else:
        d2 = jnp.sum(sq, axis=-1, keepdims=True)               # (tb, 1)

    d = jnp.sqrt(d2)
    hinge = jnp.maximum(margin - d, 0.0)
    loss = 0.5 * (lbl * d2 + (1.0 - lbl) * (hinge * hinge))    # (tb, groups)

    if need_mask:
        # Zero the fold padding and the last partial tile so the mean divides
        # by the true B.  (jnp.where selects 0 even if the padded branch is NaN.)
        tb = loss.shape[0]
        r = jax.lax.broadcasted_iota(jnp.int32, loss.shape, 0)
        g = jax.lax.broadcasted_iota(jnp.int32, loss.shape, 1)
        rows = (pl.program_id(0) * tb + r) * groups + g        # original row index
        loss = jnp.where(rows < batch, loss, 0.0)

    # Lane-dense unmasked store of this tile's partial sum into its OWN block
    # (keeps the grid axis 'parallel'); wrapper reads element [tile, 0, 0].
    out_ref[...] = jnp.full(out_ref.shape, jnp.sum(loss), dtype=out_ref.dtype)


def contrastive_loss(output1, output2, label, *, margin=MARGIN, reduction="mean",
                     max_tile_rows=None):
    """Pallas TPU implementation of ContrastiveLoss.forward."""
    if reduction not in ("mean", "sum"):
        # TODO(synk): reduction='none' (per-pair loss vector) not wired to the Pallas path.
        raise NotImplementedError("only 'mean' and 'sum' reductions are implemented")

    assert output1.shape == output2.shape and output1.ndim == 2
    batch, feat = output1.shape
    itemsize = jnp.dtype(output1.dtype).itemsize

    # ---- Fold narrow feature dims into the lane axis (D < 128) ---------------
    groups = 1
    if feat < 128:
        g = 128 // math.gcd(feat, 128)               # smallest G with (G * feat) % 128 == 0
        if g <= 32:                                   # keep the segment matmul tiny; odd D falls back
            groups = g
    gf = groups * feat

    o1, o2 = output1, output2
    lbl = label.astype(jnp.float32).reshape(batch)    # label.float()
    if groups > 1:
        b_pad = _round_up(batch, groups)
        if b_pad != batch:
            o1 = jnp.pad(o1, ((0, b_pad - batch), (0, 0)))
            o2 = jnp.pad(o2, ((0, b_pad - batch), (0, 0)))
            lbl = jnp.pad(lbl, (0, b_pad - batch))
        b_folded = b_pad // groups
        o1 = o1.reshape(b_folded, gf)                 # row-major fold: contiguous reshape
        o2 = o2.reshape(b_folded, gf)
        lbl2d = lbl.reshape(b_folded, groups)
    else:
        b_folded = batch
        lbl2d = lbl.reshape(batch, 1)

    # ---- Tiling (bytes-based, generation-aware) ------------------------------
    tb, vmem_limit = _plan_tiles(b_folded, gf, itemsize)
    if max_tile_rows is not None:
        pack = max(8, 32 // itemsize)
        tb = min(tb, max(pack, (max_tile_rows // pack) * pack))
    num_tiles = pl.cdiv(b_folded, tb)
    need_mask = (num_tiles * tb * groups != batch)    # any padded original rows?

    kernel = functools.partial(_contrastive_loss_kernel, margin=float(margin),
                               batch=batch, groups=groups, need_mask=need_mask)

    in_specs = [
        pl.BlockSpec((tb, gf), lambda i: (i, 0)),     # native dtype on the wire
        pl.BlockSpec((tb, gf), lambda i: (i, 0)),
        pl.BlockSpec((tb, groups), lambda i: (i, 0)),
    ]
    operands = [o1, o2, lbl2d]
    if groups > 1:
        # 0/1 segment matrix: seg[k, g] = 1 iff lane k belongs to original row g
        # within a folded super-row.  Loop-invariant block (constant index_map).
        seg = (jnp.arange(gf, dtype=jnp.int32)[:, None] // feat
               == jnp.arange(groups, dtype=jnp.int32)[None, :]).astype(jnp.float32)
        in_specs.insert(0, pl.BlockSpec((gf, groups), lambda i: (0, 0)))
        operands.insert(0, seg)

    cost = pl.CostEstimate(
        flops=int(5 * batch * feat + (2 * b_folded * gf * groups if groups > 1 else 0)),
        transcendentals=int(batch),
        bytes_accessed=int(2 * batch * feat * itemsize + 4 * batch
                           + num_tiles * 8 * 128 * 4),
    )

    partials = pl.pallas_call(
        kernel,
        out_shape=jax.ShapeDtypeStruct((num_tiles, 8, 128), jnp.float32),
        grid=(num_tiles,),
        in_specs=in_specs,
        out_specs=pl.BlockSpec((1, 8, 128), lambda i: (i, 0, 0)),
        compiler_params=pltpu.CompilerParams(
            # Independent per-tile output blocks keep this axis parallel
            # (megacore / dual-TC shardable on v7x; no-op on v5e/v6e).
            dimension_semantics=("parallel",),
            vmem_limit_bytes=int(vmem_limit),
        ),
        cost_estimate=cost,
    )(*operands)

    total = jnp.sum(partials[:, 0, 0])
    if reduction == "mean":
        return total / batch
    return total


def _reference(output1, output2, label, margin=MARGIN, reduction="mean"):
    # Pure-JAX reference mirroring the PyTorch module.
    label = label.astype(jnp.float32)
    o1 = output1.astype(jnp.float32)
    o2 = output2.astype(jnp.float32)
    d = jnp.sqrt(jnp.sum(jnp.square(o1 - o2 + EPS), axis=-1))
    pos = label * jnp.square(d)
    neg = (1.0 - label) * jnp.square(jnp.maximum(margin - d, 0.0))
    loss = 0.5 * (pos + neg)
    return jnp.mean(loss) if reduction == "mean" else jnp.sum(loss)


if __name__ == "__main__":
    key = jax.random.PRNGKey(0)
    k1, k2, k3 = jax.random.split(key, 3)

    # Narrow embedding (D < 128): exercises the lane-fold + segment-matmul path,
    # with B not a multiple of the fold factor (mask path).
    B, D = 50, 32
    output1 = jax.random.normal(k1, (B, D), dtype=jnp.float32) * 10.0
    output2 = jax.random.normal(k2, (B, D), dtype=jnp.float32) * 10.0
    label = (jax.random.uniform(k3, (B,)) > 0.5).astype(jnp.int32)

    ref = _reference(output1, output2, label)

    # 1) default tiling (single folded tile)
    loss = jax.block_until_ready(contrastive_loss(output1, output2, label))
    assert jnp.allclose(loss, ref, rtol=1e-4, atol=1e-3), (loss, ref)

    # 2) force a multi-tile grid (folded tiles of 8 rows -> 2 tiles, last partial)
    loss_tiled = jax.block_until_ready(
        contrastive_loss(output1, output2, label, max_tile_rows=8))
    assert jnp.allclose(loss_tiled, ref, rtol=1e-4, atol=1e-3), (loss_tiled, ref)

    # 3) reduction='sum'
    loss_sum = jax.block_until_ready(
        contrastive_loss(output1, output2, label, reduction="sum"))
    ref_sum = _reference(output1, output2, label, reduction="sum")
    assert jnp.allclose(loss_sum, ref_sum, rtol=1e-4, atol=1e-2), (loss_sum, ref_sum)

    # 4) bf16 embeddings stay bf16 on the wire; the cast happens inside the kernel.
    o1_bf16 = output1.astype(jnp.bfloat16)
    o2_bf16 = output2.astype(jnp.bfloat16)
    loss_bf16 = jax.block_until_ready(contrastive_loss(o1_bf16, o2_bf16, label))
    ref_bf16 = _reference(o1_bf16, o2_bf16, label)
    assert jnp.allclose(loss_bf16, ref_bf16, rtol=1e-3, atol=1e-1), (loss_bf16, ref_bf16)

    # 5) wide embedding (D >= 128): no folding, multi-tile, batch tile-aligned (no mask).
    B2, D2 = 64, 256
    o1w = jax.random.normal(jax.random.PRNGKey(1), (B2, D2), dtype=jnp.float32)
    o2w = jax.random.normal(jax.random.PRNGKey(2), (B2, D2), dtype=jnp.float32)
    lblw = (jax.random.uniform(jax.random.PRNGKey(3), (B2,)) > 0.5).astype(jnp.int32)
    loss_w = jax.block_until_ready(
        contrastive_loss(o1w, o2w, lblw, max_tile_rows=16))
    ref_w = _reference(o1w, o2w, lblw)
    assert jnp.allclose(loss_w, ref_w, rtol=1e-4, atol=1e-3), (loss_w, ref_w)

    print("KERNEL_OK")
</pallas_src>

<mosaic_0001>
module attributes {stable_mosaic.version = 11 : i64} {
  func.func @_contrastive_loss_kernel(%arg0: i32, %arg1: memref<128x4xf32, #tpu.memory_space<vmem>>, %arg2: memref<16x128xf32, #tpu.memory_space<vmem>>, %arg3: memref<16x128xf32, #tpu.memory_space<vmem>>, %arg4: memref<16x4xf32, #tpu.memory_space<vmem>>, %arg5: memref<1x8x128xf32, #tpu.memory_space<vmem>>) attributes {dimension_semantics = [#tpu.dimension_semantics<parallel>], iteration_bounds = array<i64: 1>, scalar_prefetch = 0 : i64, scratch_operands = 0 : i64, tpu.core_type = #tpu.core_type<tc>, window_params = [{pipeline_mode = #tpu.pipeline_mode<synchronous>, transform_indices = @transform_0, window_bounds = array<i64: 128, 4>}, {transform_indices = @transform_1, window_bounds = array<i64: 16, 128>}, {transform_indices = @transform_2, window_bounds = array<i64: 16, 128>}, {transform_indices = @transform_3, window_bounds = array<i64: 16, 4>}, {transform_indices = @transform_4, window_bounds = array<i64: 1, 8, 128>}]} {
    %c0 = arith.constant 0 : index
    %c0_0 = arith.constant 0 : index
    %0 = vector.load %arg2[%c0, %c0_0] : memref<16x128xf32, #tpu.memory_space<vmem>>, vector<16x128xf32>
    %c0_1 = arith.constant 0 : index
    %c0_2 = arith.constant 0 : index
    %1 = vector.load %arg3[%c0_1, %c0_2] : memref<16x128xf32, #tpu.memory_space<vmem>>, vector<16x128xf32>
    %c0_3 = arith.constant 0 : index
    %c0_4 = arith.constant 0 : index
    %2 = vector.load %arg4[%c0_3, %c0_4] : memref<16x4xf32, #tpu.memory_space<vmem>>, vector<16x4xf32>
    %3 = arith.subf %0, %1 : vector<16x128xf32>
    %cst = arith.constant 9.99999997E-7 : f32
    %4 = vector.broadcast %cst : f32 to vector<16x128xf32>
    %5 = arith.addf %3, %4 : vector<16x128xf32>
    %6 = arith.mulf %5, %5 : vector<16x128xf32>
    %c0_5 = arith.constant 0 : index
    %c0_6 = arith.constant 0 : index
    %7 = vector.load %arg1[%c0_5, %c0_6] : memref<128x4xf32, #tpu.memory_space<vmem>>, vector<128x4xf32>
    %cst_7 = arith.constant dense<0.000000e+00> : vector<16x4xf32>
    %8 = tpu.matmul %6, %7, %cst_7 {dimension_numbers = #tpu.dot_dimension_numbers<[1], [0], [0], [1], [0, 0, 1, 1], [], []>, precision = #tpu.contract_precision<fp32>} : vector<16x128xf32>, vector<128x4xf32>, vector<16x4xf32> -> vector<16x4xf32>
    %9 = math.sqrt %8 : vector<16x4xf32>
    %cst_8 = arith.constant 5.000000e+01 : f32
    %10 = vector.broadcast %cst_8 : f32 to vector<16x4xf32>
    %11 = arith.subf %10, %9 : vector<16x4xf32>
    %cst_9 = arith.constant 0.000000e+00 : f32
    %12 = vector.broadcast %cst_9 : f32 to vector<16x4xf32>
    %13 = arith.maximumf %11, %12 : vector<16x4xf32>
    %14 = arith.mulf %2, %8 : vector<16x4xf32>
    %cst_10 = arith.constant 1.000000e+00 : f32
    %15 = vector.broadcast %cst_10 : f32 to vector<16x4xf32>
    %16 = arith.subf %15, %2 : vector<16x4xf32>
    %17 = arith.mulf %13, %13 : vector<16x4xf32>
    %18 = arith.mulf %16, %17 : vector<16x4xf32>
    %19 = arith.addf %14, %18 : vector<16x4xf32>
    %cst_11 = arith.constant 5.000000e-01 : f32
    %20 = vector.broadcast %cst_11 : f32 to vector<16x4xf32>
    %21 = arith.mulf %20, %19 : vector<16x4xf32>
    %22 = tpu.iota {dimensions = array<i32: 0>} : vector<16x4xi32>
    %23 = tpu.iota {dimensions = array<i32: 1>} : vector<16x4xi32>
    %c16_i32 = arith.constant 16 : i32
    %24 = arith.muli %arg0, %c16_i32 : i32
    %25 = vector.broadcast %24 : i32 to vector<16x4xi32>
    %26 = arith.addi %25, %22 : vector<16x4xi32>
    %c4_i32 = arith.constant 4 : i32
    %27 = vector.broadcast %c4_i32 : i32 to vector<16x4xi32>
    %28 = arith.muli %26, %27 : vector<16x4xi32>
    %29 = arith.addi %28, %23 : vector<16x4xi32>
    %c50_i32 = arith.constant 50 : i32
    %30 = vector.broadcast %c50_i32 : i32 to vector<16x4xi32>
    %31 = arith.cmpi slt, %29, %30 : vector<16x4xi32>
    %cst_12 = arith.constant 0.000000e+00 : f32
    %32 = vector.broadcast %cst_12 : f32 to vector<16x4xf32>
    %33 = arith.select %31, %21, %32 : vector<16x4xi1>, vector<16x4xf32>
    %34 = vector.shape_cast %33 : vector<16x4xf32> to vector<1x16x4xf32>
    %cst_13 = arith.constant dense<0.000000e+00> : vector<1xf32>
    %35 = vector.multi_reduction <add>, %34, %cst_13 [1, 2] : vector<1x16x4xf32> to vector<1xf32>
    %36 = vector.shape_cast %35 : vector<1xf32> to vector<1x1x1xf32>
    %37 = vector.extract %36[0, 0, 0] : f32 from vector<1x1x1xf32>
    %38 = vector.broadcast %37 : f32 to vector<1x8x128xf32>
    %c0_14 = arith.constant 0 : index
    %c0_15 = arith.constant 0 : index
    %c0_16 = arith.constant 0 : index
    %39 = vector.load %arg5[%c0_14, %c0_15, %c0_16] : memref<1x8x128xf32, #tpu.memory_space<vmem>>, vector<1x8x128xf32>
    tpu.vector_store %arg5[%c0_14, %c0_15, %c0_16], %38 {strides = array<i32>} : memref<1x8x128xf32, #tpu.memory_space<vmem>>, vector<1x8x128xf32>,
    return
  }
  func.func @transform_0(%arg0: i32) -> (i32, i32) {
    %c0_i32 = arith.constant 0 : i32
    %c0_i32_0 = arith.constant 0 : i32
    %c0_i32_1 = arith.constant 0 : i32
    return %c0_i32, %c0_i32_0 : i32, i32
  }
  func.func @transform_1(%arg0: i32) -> (i32, i32) {
    %c0_i32 = arith.constant 0 : i32
    %c0_i32_0 = arith.constant 0 : i32
    return %arg0, %c0_i32 : i32, i32
  }
  func.func @transform_2(%arg0: i32) -> (i32, i32) {
    %c0_i32 = arith.constant 0 : i32
    %c0_i32_0 = arith.constant 0 : i32
    return %arg0, %c0_i32 : i32, i32
  }
  func.func @transform_3(%arg0: i32) -> (i32, i32) {
    %c0_i32 = arith.constant 0 : i32
    %c0_i32_0 = arith.constant 0 : i32
    return %arg0, %c0_i32 : i32, i32
  }
  func.func @transform_4(%arg0: i32) -> (i32, i32, i32) {
    %c0_i32 = arith.constant 0 : i32
    %c0_i32_0 = arith.constant 0 : i32
    %c0_i32_1 = arith.constant 0 : i32
    return %arg0, %c0_i32, %c0_i32_0 : i32, i32, i32
  }
}

</mosaic_0001>

<bundles_post_ra>
// kernel: tpu_custom_call.1
= control target key start
LH: loop header
LB: loop body
LE: loop exit
PB: predicated region body
PF: predicated region fallthrough
CT: control target
= control target key end

     0   :  { %s1739_s0 = inlined_call_operand.vmem [shape: f32[128,4], index: 0, kind: input, shape index: {}]   ;;  %s1740_s1 = inlined_call_operand.vmem [shape: f32[13,128], index: 1, kind: input, shape index: {}]   ;;  %s1741_s2 = inlined_call_operand.vmem [shape: f32[13,128], index: 2, kind: input, shape index: {}]   ;;  %s1742_s3 = inlined_call_operand.vmem [shape: f32[13,4], index: 3, kind: input, shape index: {}]   ;;  %s1743_s4 = inlined_call_operand.hbm [shape: f32[1,8,128], index: 4, kind: output, shape index: {}]  }
   0x1   :  { %v30_v0 = vld [vmem:[%s1739_s0] sm:$0xff]  ;;  %v31_v1 = vld [vmem:[%s1739_s0 + $0x8] sm:$0xff]  ;;  %v1392_v2 = vld [vmem:[%s1739_s0 + $0x10] sm:$0xff] }
   0x2   :  { %v47_v3 = vand.u32 4294901760, %v30_v0  ;;  %v50_v4 = vand.u32 4294901760, %v31_v1  ;;  %v1397_v5 = vld [vmem:[%s1739_s0 + $0x18] sm:$0xff]  ;;  %v53_v6 = vand.u32 4294901760, %v1392_v2  ;;  %v1403_v7 = vld [vmem:[%s1739_s0 + $0x20] sm:$0xff]  ;;  %v1408_v8 = vld [vmem:[%s1739_s0 + $0x28] sm:$0xff] }
   0x3   :  { %v56_v9 = vand.u32 4294901760, %v1397_v5  ;;  %v59_v11 = vand.u32 4294901760, %v1403_v7  ;;  %v62_v12 = vand.u32 4294901760, %v1408_v8  ;;  %v1424_v14 = vld [vmem:[%s1739_s0 + $0x30] sm:$0xff]  ;;  %v1429_v15 = vld [vmem:[%s1739_s0 + $0x38] sm:$0xff]  ;;  %v18_v16 = vld [vmem:[%s1740_s1] sm:$0xff] }
   0x4   :  { %v1411_v10 = vpack.c.bf16 %v50_v4, %v47_v3  ;;  %v20_v17 = vld [vmem:[%s1741_s2] sm:$0xff]  ;;  %v19_v19 = vld [vmem:[%s1740_s1 + $0x8] sm:$0xff] }
   0x5   :  { %v1419_v13 = vpack.c.bf16 %v56_v9, %v53_v6  ;;  %v24_v18 = vsub.f32 %v18_v16, %v20_v17  ;;  %v21_v20 = vld [vmem:[%s1741_s2 + $0x8] sm:$0xff] }
   0x6   :  { %1125 = vmatprep.subr.bf16.mxu1 %v1411_v10  ;;  %1221 = vmatprep.subr.bf16.mxu0 %v1411_v10 }
   0x7   :  { %1127 = vmatpush3.bf16.msra.mxu1 %v1411_v10  ;;  %1223 = vmatpush3.bf16.msra.mxu0 %v1411_v10 }
   0x8   :  { %9 = vsyncpa [#allocation3], 0  ;;  %1129 = vmatprep.subr.bf16.mxu1 %v1419_v13  ;;  %1225 = vmatprep.subr.bf16.mxu0 %v1419_v13  ;;  %v1453_v21 = vpack.c.bf16 %v62_v12, %v59_v11  ;;  %v65_v22 = vand.u32 4294901760, %v1424_v14  ;;  %v68_v23 = vand.u32 4294901760, %v1429_v15  ;;  %v1460_v24 = vld [vmem:[%s1739_s0 + $0x40] sm:$0xff]  ;;  %v1465_v25 = vld [vmem:[%s1739_s0 + $0x48] sm:$0xff]  ;;  %v25_v27 = vsub.f32 %v19_v19, %v21_v20 }
   0x9   :  { %v26_v26 = vadd.f32 1e-06, %v24_v18  ;;  %v71_v31 = vand.u32 4294901760, %v1460_v24  ;;  %v74_v32 = vand.u32 4294901760, %v1465_v25  ;;  %v1482_v33 = vld [vmem:[%s1739_s0 + $0x50] sm:$0xff]  ;;  %v1487_v34 = vld [vmem:[%s1739_s0 + $0x58] sm:$0xff]  ;;  %v1496_v38 = vsub.f32 %v30_v0, %v47_v3 }
   0xa   :  { %v27_v29 = vadd.f32 1e-06, %v25_v27  ;;  %v1475_v30 = vpack.c.bf16 %v68_v23, %v65_v22  ;;  %v77_v40 = vand.u32 4294901760, %v1482_v33  ;;  %v80_v41 = vand.u32 4294901760, %v1487_v34  ;;  %v1511_v42 = vld [vmem:[%s1739_s0 + $0x60] sm:$0xff]  ;;  %v1516_v43 = vld [vmem:[%s1739_s0 + $0x68] sm:$0xff] }
   0xb   :  { %1131 = vmatpush3.bf16.msra.mxu1 %v1419_v13  ;;  %1227 = vmatpush3.bf16.msra.mxu0 %v1419_v13  ;;  %v28_v28 = vmul.f32 %v26_v26, %v26_v26  ;;  %v1504_v39 = vpack.c.bf16 %v74_v32, %v71_v31  ;;  %v1518_v44 = vsub.f32 %v31_v1, %v50_v4  ;;  %v83_v47 = vand.u32 4294901760, %v1511_v42  ;;  %v1540_v52 = vld [vmem:[%s1739_s0 + $0x70] sm:$0xff]  ;;  %v1545_v53 = vld [vmem:[%s1739_s0 + $0x78] sm:$0xff] }
   0xc   :  { %1133 = vmatprep.subr.bf16.mxu1 %v1453_v21  ;;  %1229 = vmatprep.subr.bf16.mxu0 %v1453_v21  ;;  %v29_v36 = vmul.f32 %v27_v29, %v27_v29  ;;  %v86_v48 = vand.u32 4294901760, %v1516_v43  ;;  %v150_v50 = vand.u32 4294901760, %v1496_v38  ;;  %v1535_v51 = vpack.c.bf16 %v80_v41, %v77_v40 }
   0xd   :  { %v1489_v35 = vand.u32 4294901760, %v28_v28  ;;  %v157_v54 = vand.u32 4294901760, %v1518_v44  ;;  %v1551_v55 = vsub.f32 %v1392_v2, %v53_v6  ;;  %v1556_v56 = vsub.f32 %v1397_v5, %v56_v9 }
   0xe   :  { %v1521_v46 = vand.u32 4294901760, %v29_v36  ;;  %v1564_v59 = vsub.f32 %v1403_v7, %v59_v11  ;;  %v1572_v60 = vpack.c.bf16 %v86_v48, %v83_v47  ;;  %v89_v61 = vand.u32 4294901760, %v1540_v52 }
   0xf   :  { %1135 = vmatpush3.bf16.msra.mxu1 %v1453_v21  ;;  %1231 = vmatpush3.bf16.msra.mxu0 %v1453_v21  ;;  %v1494_v37 = vsub.f32 %v28_v28, %v1489_v35  ;;  %v92_v62 = vand.u32 4294901760, %v1545_v53  ;;  %v151_v63 = vsub.f32 %v1496_v38, %v150_v50  ;;  %v158_v0 = vsub.f32 %v1518_v44, %v157_v54 }
  0x10   :  { %1137 = vmatprep.subr.bf16.mxu1 %v1475_v30  ;;  %1233 = vmatprep.subr.bf16.mxu0 %v1475_v30  ;;  %v1559_v58 = vsub.f32 %v29_v36, %v1521_v46  ;;  %v164_v1 = vand.u32 4294901760, %v1551_v55  ;;  %v171_v2 = vand.u32 4294901760, %v1556_v56  ;;  %v1585_v3 = vsub.f32 %v1408_v8, %v62_v12 }
  0x11   :  { %v129_v45 = vand.u32 4294901760, %v1494_v37  ;;  %v178_v5 = vand.u32 4294901760, %v1564_v59  ;;  %v1595_v6 = vpack.c.bf16 %v92_v62, %v89_v61  ;;  %v152_v7 = vand.u32 4294901760, %v151_v63 }
  0x12   :  { %v139_v4 = vand.u32 4294901760, %v1559_v58  ;;  %v1600_v8 = vsub.f32 %v1424_v14, %v65_v22  ;;  %v1605_v9 = vsub.f32 %v1429_v15, %v68_v23  ;;  %v159_v11 = vand.u32 4294901760, %v158_v0 }
  0x13   :  { %1139 = vmatpush3.bf16.msra.mxu1 %v1475_v30  ;;  %1235 = vmatpush3.bf16.msra.mxu0 %v1475_v30  ;;  %v130_v49 = vsub.f32 %v1494_v37, %v129_v45  ;;  %v165_v12 = vsub.f32 %v1551_v55, %v164_v1  ;;  %v172_v16 = vsub.f32 %v1556_v56, %v171_v2  ;;  %v185_v17 = vand.u32 4294901760, %v1585_v3 }
  0x14   :  { %1141 = vmatprep.subr.bf16.mxu1 %v1504_v39  ;;  %1237 = vmatprep.subr.bf16.mxu0 %v1504_v39  ;;  %v1252_v18 = vpack.c.bf16 %v157_v54, %v150_v50  ;;  %v140_v14 = vsub.f32 %v1559_v58, %v139_v4  ;;  %v179_v19 = vsub.f32 %v1564_v59, %v178_v5  ;;  %v192_v15 = vand.u32 4294901760, %v1600_v8 }
  0x15   :  { %v131_v57 = vand.u32 4294901760, %v130_v49  ;;  %1051 = vmatprep.mubr.f32.mxu0 %v129_v45  ;;  %v199_v20 = vand.u32 4294901760, %v1605_v9  ;;  %v1621_v22 = vsub.f32 %v1460_v24, %v71_v31  ;;  %v1626_v23 = vsub.f32 %v1465_v25, %v74_v32 }
  0x16   :  { %v1156_v26 = vpack.c.bf16 %v159_v11, %v152_v7  ;;  %v166_v27 = vand.u32 4294901760, %v165_v12  ;;  %v173_v28 = vand.u32 4294901760, %v172_v16  ;;  %v186_v29 = vsub.f32 %v1585_v3, %v185_v17 }
  0x17   :  { %1143 = vmatpush3.bf16.msra.mxu1 %v1504_v39  ;;  %1239 = vmatpush3.bf16.msra.mxu0 %v1504_v39  ;;  %v141_v36 = vand.u32 4294901760, %v140_v14  ;;  %v1256_v45 = vpack.c.bf16 %v171_v2, %v164_v1  ;;  %v1634_v24 = vsub.f32 %v1482_v33, %v77_v40  ;;  %v193_v25 = vsub.f32 %v1600_v8, %v192_v15 }
  0x18   :  { %1145 = vmatprep.subr.bf16.mxu1 %v1535_v51  ;;  %1241 = vmatprep.subr.bf16.mxu0 %v1535_v51  ;;  %v200_v31 = vsub.f32 %v1605_v9, %v199_v20  ;;  %v206_v32 = vand.u32 4294901760, %v1621_v22  ;;  %v213_v49 = vand.u32 4294901760, %v1626_v23  ;;  %v1160_v50 = vpack.c.bf16 %v173_v28, %v166_v27 }
  0x19   :  { %946 = vmatprep.mubr.f32.mxu1 %v131_v57  ;;  %v180_v54 = vand.u32 4294901760, %v179_v19  ;;  %v187_v57 = vand.u32 4294901760, %v186_v29  ;;  %v1645_v33 = vsub.f32 %v1487_v34, %v80_v41  ;;  %v1260_v40 = vpack.c.bf16 %v185_v17, %v178_v5 }
  0x1a   :  { %v220_v63 = vand.u32 4294901760, %v1634_v24  ;;  %v194_v0 = vand.u32 4294901760, %v193_v25  ;;  %v201_v1 = vand.u32 4294901760, %v200_v31  ;;  %v207_v2 = vsub.f32 %v1621_v22, %v206_v32 }
  0x1b   :  { %1147 = vmatpush3.bf16.msra.mxu1 %v1535_v51  ;;  %1243 = vmatpush3.bf16.msra.mxu0 %v1535_v51  ;;  %v214_v7 = vsub.f32 %v1626_v23, %v213_v49  ;;  %v1164_v11 = vpack.c.bf16 %v187_v57, %v180_v54  ;;  %v227_v12 = vand.u32 4294901760, %v1645_v33  ;;  %v1654_v34 = vsub.f32 %v1511_v42, %v83_v47 }
  0x1c   :  { %1149 = vmatprep.subr.bf16.mxu1 %v1572_v60  ;;  %1245 = vmatprep.subr.bf16.mxu0 %v1572_v60  ;;  %v1659_v41 = vsub.f32 %v1516_v43, %v86_v48  ;;  %v221_v5 = vsub.f32 %v1634_v24, %v220_v63  ;;  %v1168_v16 = vpack.c.bf16 %v201_v1, %v194_v0  ;;  %v208_v17 = vand.u32 4294901760, %v207_v2  ;;  %v23_v2 = vld [vmem:[%s1742_s3 + $0x8] sm:$0xff] }
  0x1d   :  { %v1667_v42 = vsub.f32 %v1540_v52, %v89_v61  ;;  %v228_v43 = vsub.f32 %v1645_v33, %v227_v12  ;;  %v234_v47 = vand.u32 4294901760, %v1654_v34  ;;  %v1675_v14 = vsub.f32 %v1545_v53, %v92_v62 }
  0x1e   :  { %v241_v48 = vand.u32 4294901760, %v1659_v41  ;;  %v1272_v53 = vpack.c.bf16 %v227_v12, %v220_v63  ;;  %v1192_v63 = vpack.c.bf16 %v1556_v56, %v1551_v55  ;;  %vm777_vm6 = vcmask 31744  }
  0x1f   :  { %1151 = vmatpush3.bf16.msra.mxu1 %v1572_v60  ;;  %1247 = vmatpush3.bf16.msra.mxu0 %v1572_v60  ;;  %v248_v52 = vand.u32 4294901760, %v1667_v42  ;;  %v229_v61 = vand.u32 4294901760, %v228_v43  ;;  %v255_v28 = vand.u32 4294901760, %v1675_v14 }
  0x20   :  { %1153 = vmatprep.subr.bf16.mxu1 %v1595_v6  ;;  %1249 = vmatprep.subr.bf16.mxu0 %v1595_v6  ;;  %v242_v27 = vsub.f32 %v1659_v41, %v241_v48 }
  0x21   :  { %v249_v62 = vsub.f32 %v1667_v42, %v248_v52  ;;  %v256_v25 = vsub.f32 %v1675_v14, %v255_v28  ;;  %v1280_v57 = vpack.c.bf16 %v255_v28, %v248_v52 }
  0x23   :  { %1155 = vmatpush3.bf16.msra.mxu1 %v1595_v6  ;;  %1251 = vmatpush3.bf16.msra.mxu0 %v1595_v6 }
  0x24   :  { %1157 = vmatprep.subr.bf16.mxu1 %v1156_v26  ;;  %1253 = vmatprep.subr.bf16.mxu0 %v1252_v18 }
  0x26   :  { %947 = vmatmul.mubr.f32.vlgmr.msra.gmra.mrb[0].mxu1 %v141_v36  ;;  %1052 = vmatmul.mubr.f32.vlgmr.msra.gmra.mrb[0].mxu0 %v139_v4  ;;  %v1264_v4 = vpack.c.bf16 %v199_v20, %v192_v15  ;;  %v1268_v15 = vpack.c.bf16 %v213_v49, %v206_v32  ;;  %v222_v20 = vand.u32 4294901760, %v221_v5  ;;  %v1276_v32 = vpack.c.bf16 %v241_v48, %v234_v47 }
  0x27   :  { %1159 = vmatpush3.bf16.msra.mxu1 %v1156_v26  ;;  %1255 = vmatpush3.bf16.msra.mxu0 %v1252_v18  ;;  %v215_v18 = vand.u32 4294901760, %v214_v7  ;;  %v235_v26 = vsub.f32 %v1654_v34, %v234_v47  ;;  %v250_v49 = vand.u32 4294901760, %v249_v62 }
  0x28   :  { %1161 = vmatprep.subr.bf16.mxu1 %v1160_v50  ;;  %1257 = vmatprep.subr.bf16.mxu0 %v1256_v45  ;;  %v1176_v29 = vpack.c.bf16 %v229_v61, %v222_v20 }
  0x29   :  { %981 = vmatprep.mubr.f32.mxu1 %v1489_v35  ;;  %1086 = vmatprep.mubr.f32.mxu0 %v1489_v35  ;;  %v1172_v19 = vpack.c.bf16 %v215_v18, %v208_v17  ;;  %v236_v36 = vand.u32 4294901760, %v235_v26 }
  0x2b   :  { %1163 = vmatpush3.bf16.msra.mxu1 %v1160_v50  ;;  %1259 = vmatpush3.bf16.msra.mxu0 %v1256_v45  ;;  %v243_v45 = vand.u32 4294901760, %v242_v27  ;;  %v257_v50 = vand.u32 4294901760, %v256_v25 }
  0x2c   :  { %1165 = vmatprep.subr.bf16.mxu1 %v1164_v11  ;;  %1261 = vmatprep.subr.bf16.mxu0 %v1260_v40 }
  0x2d   :  { %v1180_v31 = vpack.c.bf16 %v243_v45, %v236_v36  ;;  %v1184_v54 = vpack.c.bf16 %v257_v50, %v250_v49 }
  0x2f   :  { %1167 = vmatpush3.bf16.msra.mxu1 %v1164_v11  ;;  %1263 = vmatpush3.bf16.msra.mxu0 %v1260_v40  ;;  %v1188_v40 = vpack.c.bf16 %v1518_v44, %v1496_v38  ;;  %v1196_v38 = vpack.c.bf16 %v1585_v3, %v1564_v59  ;;  %v1200_v44 = vpack.c.bf16 %v1605_v9, %v1600_v8  ;;  %v760_v59 = vlaneseq }
  0x30   :  { %1169 = vmatprep.subr.bf16.mxu1 %v1168_v16  ;;  %1265 = vmatprep.subr.bf16.mxu0 %v1264_v4 }
  0x31   :  { %v764_v11 = vand.u32 127, %v760_v59 }
  0x33   :  { %1171 = vmatpush3.bf16.msra.mxu1 %v1168_v16  ;;  %1267 = vmatpush3.bf16.msra.mxu0 %v1264_v4  ;;  %v751_v4 = vsub.f32 1.0, %v23_v2 }
  0x34   :  { %1173 = vmatprep.subr.bf16.mxu1 %v1172_v19  ;;  %1269 = vmatprep.subr.bf16.mxu0 %v1268_v15 }
  0x37   :  { %1175 = vmatpush3.bf16.msra.mxu1 %v1172_v19  ;;  %1271 = vmatpush3.bf16.msra.mxu0 %v1268_v15 }
  0x38   :  { %1177 = vmatprep.subr.bf16.mxu1 %v1176_v29  ;;  %1273 = vmatprep.subr.bf16.mxu0 %v1272_v53 }
  0x3b   :  { %1179 = vmatpush3.bf16.msra.mxu1 %v1176_v29  ;;  %1275 = vmatpush3.bf16.msra.mxu0 %v1272_v53 }
  0x3c   :  { %1181 = vmatprep.subr.bf16.mxu1 %v1180_v31  ;;  %1277 = vmatprep.subr.bf16.mxu0 %v1276_v32 }
  0x3f   :  { %1183 = vmatpush3.bf16.msra.mxu1 %v1180_v31  ;;  %1279 = vmatpush3.bf16.msra.mxu0 %v1276_v32 }
  0x40   :  { %1185 = vmatprep.subr.bf16.mxu1 %v1184_v54  ;;  %1281 = vmatprep.subr.bf16.mxu0 %v1280_v57 }
  0x43   :  { %1187 = vmatpush3.bf16.msra.mxu1 %v1184_v54  ;;  %1283 = vmatpush3.bf16.msra.mxu0 %v1280_v57 }
  0x44   :  { %1189 = vmatprep.subr.bf16.mxu1 %v1188_v40  ;;  %1285 = vmatprep.subr.bf16.mxu0 %v1411_v10 }
  0x46   :  { %982 = vmatmul.mubr.f32.vlgmr.msra.gmra.mrb[0].mxu1 %v1521_v46  ;;  %1087 = vmatmul.mubr.f32.vlgmr.msra.gmra.mrb[0].mxu0 %v1521_v46 }
  0x47   :  { %1191 = vmatpush3.bf16.msra.mxu1 %v1188_v40  ;;  %1287 = vmatpush3.bf16.msra.mxu0 %v1411_v10  ;;  %v1204_v10 = vpack.c.bf16 %v1626_v23, %v1621_v22 }
  0x48   :  { %1193 = vmatprep.subr.bf16.mxu1 %v1192_v63  ;;  %1289 = vmatprep.subr.bf16.mxu0 %v1419_v13 }
  0x49   :  { %1016 = vmatprep.mubr.f32.mxu1 %v1494_v37  ;;  %1121 = vmatprep.mubr.f32.mxu0 %v1489_v35 }
  0x4b   :  { %1195 = vmatpush3.bf16.msra.mxu1 %v1192_v63  ;;  %1291 = vmatpush3.bf16.msra.mxu0 %v1419_v13  ;;  %v1208_v13 = vpack.c.bf16 %v1645_v33, %v1634_v24 }
  0x4c   :  { %1197 = vmatprep.subr.bf16.mxu1 %v1196_v38  ;;  %1293 = vmatprep.subr.bf16.mxu0 %v1453_v21 }
  0x4f   :  { %1199 = vmatpush3.bf16.msra.mxu1 %v1196_v38  ;;  %1295 = vmatpush3.bf16.msra.mxu0 %v1453_v21  ;;  %v1212_v21 = vpack.c.bf16 %v1659_v41, %v1654_v34  ;;  %v22_v34 = vld [vmem:[%s1742_s3] sm:$0xff]  ;;  %s1357_s3 = smov [#allocation2]  }
  0x50   :  { %1201 = vmatprep.subr.bf16.mxu1 %v1200_v44  ;;  %1297 = vmatprep.subr.bf16.mxu0 %v1475_v30  ;;  %v750_v17 = vsub.f32 1.0, %v22_v34  ;;  %s798_s30 = sshll.u32 %s1357_s3, 4  ;;  %s799_s30 = int_to_ptr.vmem [resolvable:$true] %s798_s30 }
  0x51   :  { %s1333_s6 = scalar_lea.vmem %s799_s30, 128  ;;  %p1338_p1 = scmp.lt.s32.totalorder %s799_s30, %s799_s30 }
  0x52   :  { %p1334_p0 = scmp.ne.s32.totalorder %s799_s30, %s1333_s6  ;;  %p1339_p2 = scmp.lt.s32.totalorder %s1333_s6, %s1333_s6 }
  0x53   :  { %1203 = vmatpush3.bf16.msra.mxu1 %v1200_v44  ;;  %1299 = vmatpush3.bf16.msra.mxu0 %v1475_v30  ;;  %v1216_v30 = vpack.c.bf16 %v1675_v14, %v1667_v42 }
  0x54   :  { %1205 = vmatprep.subr.bf16.mxu1 %v1204_v10  ;;  %1301 = vmatprep.subr.bf16.mxu0 %v1504_v39  ;;  %p1340_p3 = por %p1339_p2, %p1338_p1 }
  0x56   :  { %p1341_p4 = pnand %p1340_p3, %p1334_p0 }
  0x57   :  { %1207 = vmatpush3.bf16.msra.mxu1 %v1204_v10  ;;  %1303 = vmatpush3.bf16.msra.mxu0 %v1504_v39 }
  0x58   :  { %1209 = vmatprep.subr.bf16.mxu1 %v1208_v13  ;;  %1305 = vmatprep.subr.bf16.mxu0 %v1535_v51 }
  0x5b   :  { %1211 = vmatpush3.bf16.msra.mxu1 %v1208_v13  ;;  %1307 = vmatpush3.bf16.msra.mxu0 %v1535_v51 }
  0x5c   :  { %1213 = vmatprep.subr.bf16.mxu1 %v1212_v21  ;;  %1309 = vmatprep.subr.bf16.mxu0 %v1572_v60 }
  0x5f   :  { %1215 = vmatpush3.bf16.msra.mxu1 %v1212_v21  ;;  %1311 = vmatpush3.bf16.msra.mxu0 %v1572_v60  ;;  %v761_v60 = vshrl.u32 %v760_v59, 7 }
  0x60   :  { %1217 = vmatprep.subr.bf16.mxu1 %v1216_v30  ;;  %1313 = vmatprep.subr.bf16.mxu0 %v1595_v6 }
  0x61   :  { %v762_v23 = vadd.s32 8, %v761_v60  ;;  %v769_v5 = vmul.u32 4, %v761_v60 }
  0x63   :  { %1219 = vmatpush3.bf16.msra.mxu1 %v1216_v30  ;;  %1315 = vmatpush3.bf16.msra.mxu0 %v1595_v6  ;;  %v770_v12 = vmul.u32 4, %v762_v23  ;;  %v771_v14 = vadd.s32 %v769_v5, %v764_v11 }
  0x65   :  { %v772_v43 = vadd.s32 %v770_v12, %v764_v11  ;;  %vm773_vm5 = vcmp.lt.s32.totalorder %v771_v14, 50 }
  0x66   :  { %1017 = vmatmul.mubr.f32.vlgmr.msra.gmra.mrb[0].mxu1 %v1559_v58  ;;  %1122 = vmatmul.mubr.f32.vlgmr.msra.gmra.mrb[0].mxu0 %v1521_v46 }
  0x67   :  { %vm774_vm4 = vcmp.lt.s32.totalorder %v772_v43, 50 }
 0x139   :  { %v1018_v35 = vpop.f32.mrb[0].mxu1  ;;  %v1123_v37 = vpop.f32.mrb[0].mxu0 }
 0x13a   :  { %v1316_v39 = vadd.f32 %v1123_v37, %v1018_v35  ;;  %v404_v51 = vpop.f32.mrb[1].mxu1  ;;  %v720_v55 = vpop.f32.mrb[1].mxu0 }
 0x13b   :  { %v1317_v56 = vadd.f32 %v720_v55, %v404_v51 }
 0x13c   :  { %1329 = vrsqrt.f32 %v1316_v39  ;;  %vm739_vm0 = vcmp.eq.f32.partialorder %v1316_v39, inf  ;;  %v742_v6 = vand.u32 2147483648, %v1316_v39  ;;  %vm741_vm2 = vcmp.eq.f32.partialorder %v1316_v39, 0.0 }
 0x13d   :  { %1331 = vrsqrt.f32 %v1317_v56  ;;  %vm732_vm1 = vcmp.eq.f32.partialorder %v1317_v56, inf  ;;  %v735_v58 = vand.u32 2147483648, %v1317_v56  ;;  %vm734_vm3 = vcmp.eq.f32.partialorder %v1317_v56, 0.0 }
 0x13e   :  { %v749_v47 = vmul.f32 %v1316_v39, %v23_v2  ;;  %v748_v19 = vmul.f32 %v1317_v56, %v22_v34 }
 0x146   :  { %v1330_v3 = vpop.eup %1329 }
 0x147   :  { %v1332_v8 = vpop.eup %1331  ;;  %v738_v9 = vmul.f32 %v1330_v3, %v1316_v39 }
 0x148   :  { %v731_v22 = vmul.f32 %v1332_v8, %v1317_v56 }
 0x149   :  { %v740_v46 = vsel %vm739_vm0, %v1316_v39, %v738_v9 }
 0x14a   :  { %v733_v24 = vsel %vm732_vm1, %v1317_v56, %v731_v22  ;;  %v743_v33 = vsel %vm741_vm2, %v742_v6, %v740_v46 }
 0x14b   :  { %v736_v0 = vsel %vm734_vm3, %v735_v58, %v733_v24  ;;  %v745_v1 = vsub.f32 50.0, %v743_v33 }
 0x14c   :  { %v744_v7 = vsub.f32 50.0, %v736_v0 }
 0x14d   :  { %v747_v41 = vmax.f32 %v745_v1, 0.0 }
 0x14e   :  { %v746_v16 = vmax.f32 %v744_v7, 0.0 }
 0x14f   :  { %v753_v18 = vmul.f32 %v747_v41, %v747_v41 }
 0x150   :  { %v752_v42 = vmul.f32 %v746_v16, %v746_v16 }
 0x151   :  { %v755_v48 = vmul.f32 %v753_v18, %v751_v4 }
 0x152   :  { %v754_v15 = vmul.f32 %v752_v42, %v750_v17 }
 0x153   :  { %v757_v20 = vadd.f32 %v755_v48, %v749_v47 }
 0x154   :  { %v756_v52 = vadd.f32 %v754_v15, %v748_v19 }
 0x155   :  { %v759_v61 = vmul.f32 0.5, %v757_v20 }
 0x156   :  { %v758_v26 = vmul.f32 0.5, %v756_v52 }
 0x157   :  { %v776_v27 = vsel %vm774_vm4, %v759_v61, 0.0 }
 0x158   :  { %v775_v28 = vsel %vm773_vm5, %v758_v26, 0.0  ;;  %v779_v53 = vsel %vm777_vm6, %v776_v27, 0.0 }
 0x159   :  { %v778_v62 = vsel %vm777_vm6, %v775_v28, 0.0 }
 0x15a   :  { %v780_v29 = vadd.f32 %v779_v53, %v778_v62 }
 0x15c   :  { %781 = vadd.xlane.f32.xlu0 %v780_v29 }
 0x1e9   :  { %v782_v36 = vpop.xlane.xlu0 %781 }
 0x1ea   :  { %v783_v45 = vrot.slane %v782_v36, 4 }
 0x1ec   :  { %v784_v25 = vadd.f32 %v783_v45, %v782_v36 }
 0x1ee   :  { %v785_v31 = vrot.slane %v784_v25, 2 }
 0x1f0   :  { %v786_v32 = vadd.f32 %v785_v31, %v784_v25 }
 0x1f2   :  { %v787_v49 = vrot.slane %v786_v32, 1 }
 0x1f4   :  { %v788_v50 = vadd.f32 %v787_v49, %v786_v32 }
 0x1f6   :  { %1326 = vpush %v788_v50 }
 0x227   :  { %s1327_s5 = spop %1326 }
 0x228   :  { %v790_v54 = vstv %s1327_s5 }
 0x229   :  { %791 = vst [vmem:[#allocation2] sm:$0xff] %v790_v54 }
 0x22a   :  { %1344 = shalt.err (!%p1341_p4)
}
 0x22b   :  { %s1345_s9 = scalar_lea.hbm %s1743_s4, 128 }
 0x22c   :  { %p1346_p5 = scmp.ne.s32.totalorder %s1743_s4, %s1345_s9  ;;  %p1349_p6 = scmp.lt.u32.totalorder %s1345_s9, %s1743_s4 }
 0x22e   :  { %p1351_p7 = pnand %p1349_p6, %p1346_p5 }
 0x230   :  { %1354 = shalt.err (!%p1351_p7)
}
 0x231   :  { %801 = dma.vmem_to_hbm [thread:$0]  %s799_s30, 128, %s1743_s4, [#allocation3]  }
 0x232   :  { %1355 = dma.done.wait [#allocation3], 128  }
 0x233   :  { %1356 = vsyncadd [#allocation3], 4294967168 }
 0x234   :  { %805 = vsyncpa [#allocation3], 1 }

</bundles_post_ra>
